<compile_context>
chip_gen: v7x
topology: tpu7x:2x2x1
jax: 0.10.0
libtpu: 0.0.40
codegen_flags: <defaults>
</compile_context>

<pallas_src>
import functools
import math

import jax
import jax.numpy as jnp
from jax.experimental import pallas as pl
from jax.experimental.pallas import tpu as pltpu


def _round_up(x, m):
    return ((x + m - 1) // m) * m


def _slab_layout(layer_dims):
    """Row layout of the packed parameter slab.

    Layer i gets a weight block of K_i rows followed by one bias row, padded to a
    multiple of 8 rows so every block starts sublane-aligned.
      K_0      = round_up(dim_obs, 8)   (matches the lane width of the obs tile)
      K_{i>0}  = C (the 128-padded lane width) because the incoming activation is
                 kept C lanes wide; the extra rows are zero and multiply the
                 activation's zero padding columns.
    Returns (per-layer (w_off, k_rows, b_off), total_rows, n_cols).
    """
    c = _round_up(max(d_out for _, d_out in layer_dims), 128)
    specs = []
    r = 0
    for i, (d_in, _) in enumerate(layer_dims):
        k = _round_up(d_in, 8) if i == 0 else c
        specs.append((r, k, r + k))
        r = _round_up(r + k + 1, 8)
    return tuple(specs), r, c


def pack_actor_params(params, layer_dims):
    """Pack w1,b1,...,wN,bN into a single zero-padded [R, C] f32 slab."""
    specs, total_rows, c = _slab_layout(layer_dims)
    slab = jnp.zeros((total_rows, c), jnp.float32)
    for i, ((d_in, d_out), (w_off, _, b_off)) in enumerate(zip(layer_dims, specs)):
        w = params[f"w{i + 1}"].astype(jnp.float32)                  # (d_in, d_out)
        b = params[f"b{i + 1}"].reshape(1, d_out).astype(jnp.float32)
        slab = slab.at[w_off:w_off + d_in, :d_out].set(w)
        slab = slab.at[b_off:b_off + 1, :d_out].set(b)
    return slab


def _actor_kernel(layer_specs, dim_action, x_ref, p_ref, o_ref):
    """Fused MLP on one batch tile.

    Every matmul is (TB, K) x (K, C) with C = 128-padded lane width, so the
    activation stays lane-dense across layers.  Padded lanes are exactly zero.
    """
    x = x_ref[...]
    n = len(layer_specs)
    for li, (w_off, k_rows, b_off) in enumerate(layer_specs):
        w = p_ref[w_off:w_off + k_rows, :]            # (K, C) static, aligned slice
        b = p_ref[b_off:b_off + 1, :]                 # (1, C)
        y = jnp.dot(x, w, preferred_element_type=jnp.float32) + b
        if li == n - 1:
            o_ref[...] = jnp.tanh(y[:, :dim_action])  # real action lanes only
        else:
            x = jnp.maximum(y, 0.0)


def actor_net_forward(obs, packed, *, layer_dims, block_b=512):
    """obs: [B, dim_obs] f32. packed: packed parameter slab. layer_dims static."""
    dim_obs = layer_dims[0][0]
    dim_action = layer_dims[-1][1]
    specs, _, _ = _slab_layout(layer_dims)
    k0 = specs[0][1]                                  # padded obs feature width

    B = obs.shape[0]
    obs = obs.astype(jnp.float32)
    if k0 != dim_obs:                                 # zero-pad features (no-op here)
        obs = jnp.pad(obs, ((0, 0), (0, k0 - dim_obs)))

    tb = min(block_b, _round_up(B, 8))                # batch tile, multiple of 8
    b_pad = _round_up(B, tb)
    if b_pad != B:
        obs = jnp.pad(obs, ((0, b_pad - B), (0, 0)))
    num_tiles = b_pad // tb

    flops = 2 * b_pad * sum(d_in * d_out for d_in, d_out in layer_dims)
    bytes_accessed = 4 * (b_pad * k0 + packed.size + b_pad * dim_action)

    out = pl.pallas_call(
        functools.partial(_actor_kernel, specs, dim_action),
        out_shape=jax.ShapeDtypeStruct((b_pad, dim_action), jnp.float32),
        grid=(num_tiles,),
        in_specs=[
            # Batch tile streams through the pipeline.
            pl.BlockSpec((tb, k0), lambda i: (i, 0)),
            # Single packed parameter slab; constant index -> DMA'd once, VMEM-resident.
            pl.BlockSpec(packed.shape, lambda i: (0, 0)),
        ],
        out_specs=pl.BlockSpec((tb, dim_action), lambda i: (i, 0)),
        compiler_params=pltpu.CompilerParams(dimension_semantics=("parallel",)),
        cost_estimate=pl.CostEstimate(
            flops=flops,
            transcendentals=b_pad * dim_action,       # tanh on the output layer
            bytes_accessed=bytes_accessed,
        ),
    )(obs, packed)
    return out[:B]


def xavier_uniform(key, dim_in, dim_out):
    """Matches torch.nn.init.xavier_uniform_ on a (dim_out, dim_in) weight,
    returned pre-transposed as (dim_in, dim_out)."""
    bound = math.sqrt(6.0 / (dim_in + dim_out))
    w = jax.random.uniform(key, (dim_out, dim_in), jnp.float32, -bound, bound)
    return w.T


def init_actor_params(key, dim_obs, dim_action, dims_hidden=(64, 64)):
    """xavier_uniform weights, zero biases — matches the PyTorch module's init."""
    n_neurons = (dim_obs,) + tuple(dims_hidden) + (dim_action,)
    keys = jax.random.split(key, len(n_neurons) - 1)
    params = {}
    for i, (d_in, d_out) in enumerate(zip(n_neurons[:-1], n_neurons[1:])):
        params[f"w{i + 1}"] = xavier_uniform(keys[i], d_in, d_out)
        params[f"b{i + 1}"] = jnp.zeros((d_out,), jnp.float32)
    return params


def actor_net_ref(obs, params):
    """Pure-JAX reference of the same forward pass (correctness check)."""
    n_layers = len(params) // 2
    x = obs
    for i in range(1, n_layers):
        x = jnp.maximum(x @ params[f"w{i}"] + params[f"b{i}"], 0.0)
    return jnp.tanh(x @ params[f"w{n_layers}"] + params[f"b{n_layers}"])


if __name__ == "__main__":
    key = jax.random.PRNGKey(0)
    k_param, k_obs, k_obs_big = jax.random.split(key, 3)

    dim_obs, dim_action = 16, 8
    dims_hidden = (64, 64)  # module default
    layer_dims = tuple(zip((dim_obs,) + dims_hidden, dims_hidden + (dim_action,)))

    params = init_actor_params(k_param, dim_obs, dim_action, dims_hidden)
    packed = pack_actor_params(params, layer_dims)

    fwd = jax.jit(actor_net_forward, static_argnames=("layer_dims", "block_b"))

    # Small batch (latency path; single tile, TB shrinks to 8).
    obs_small = jax.random.normal(k_obs, (8, dim_obs), jnp.float32)
    out_small = jax.block_until_ready(fwd(obs_small, packed, layer_dims=layer_dims))
    ref_small = actor_net_ref(obs_small, params)
    assert out_small.shape == (8, dim_action), out_small.shape
    assert jnp.allclose(out_small, ref_small, atol=1e-5, rtol=1e-5), "small-batch mismatch"

    # Larger ragged batch (exercises the batch grid, padding, VMEM-resident weights).
    obs_big = jax.random.normal(k_obs_big, (300, dim_obs), jnp.float32)
    out_big = jax.block_until_ready(
        fwd(obs_big, packed, layer_dims=layer_dims, block_b=128))
    ref_big = actor_net_ref(obs_big, params)
    assert out_big.shape == (300, dim_action), out_big.shape
    assert jnp.allclose(out_big, ref_big, atol=1e-5, rtol=1e-5), "big-batch mismatch"

    print("KERNEL_OK")
</pallas_src>

<mosaic_0001>
module attributes {stable_mosaic.version = 11 : i64} {
  func.func @_actor_kernel(%arg0: i32, %arg1: memref<8x16xf32, #tpu.memory_space<vmem>>, %arg2: memref<296x128xf32, #tpu.memory_space<vmem>>, %arg3: memref<8x8xf32, #tpu.memory_space<vmem>>) attributes {dimension_semantics = [#tpu.dimension_semantics<parallel>], iteration_bounds = array<i64: 1>, scalar_prefetch = 0 : i64, scratch_operands = 0 : i64, tpu.core_type = #tpu.core_type<tc>, window_params = [{transform_indices = @transform_0, window_bounds = array<i64: 8, 16>}, {pipeline_mode = #tpu.pipeline_mode<synchronous>, transform_indices = @transform_1, window_bounds = array<i64: 296, 128>}, {transform_indices = @transform_2, window_bounds = array<i64: 8, 8>}]} {
    %c0 = arith.constant 0 : index
    %c0_0 = arith.constant 0 : index
    %0 = vector.load %arg1[%c0, %c0_0] : memref<8x16xf32, #tpu.memory_space<vmem>>, vector<8x16xf32>
    %c0_1 = arith.constant 0 : index
    %c0_2 = arith.constant 0 : index
    %1 = vector.load %arg2[%c0_1, %c0_2] : memref<296x128xf32, #tpu.memory_space<vmem>>, vector<16x128xf32>
    %c16 = arith.constant 16 : index
    %c0_3 = arith.constant 0 : index
    %2 = vector.load %arg2[%c16, %c0_3] : memref<296x128xf32, #tpu.memory_space<vmem>>, vector<1x128xf32>
    %cst = arith.constant dense<0.000000e+00> : vector<8x128xf32>
    %3 = tpu.matmul %0, %1, %cst {dimension_numbers = #tpu.dot_dimension_numbers<[1], [0], [0], [1], [0, 0, 1, 1], [], []>} : vector<8x16xf32>, vector<16x128xf32>, vector<8x128xf32> -> vector<8x128xf32>
    %4 = vector.broadcast %2 : vector<1x128xf32> to vector<8x128xf32>
    %5 = arith.addf %3, %4 : vector<8x128xf32>
    %cst_4 = arith.constant 0.000000e+00 : f32
    %6 = vector.broadcast %cst_4 : f32 to vector<8x128xf32>
    %7 = arith.maximumf %5, %6 : vector<8x128xf32>
    %c24 = arith.constant 24 : index
    %c0_5 = arith.constant 0 : index
    %8 = vector.load %arg2[%c24, %c0_5] : memref<296x128xf32, #tpu.memory_space<vmem>>, vector<128x128xf32>
    %c152 = arith.constant 152 : index
    %c0_6 = arith.constant 0 : index
    %9 = vector.load %arg2[%c152, %c0_6] : memref<296x128xf32, #tpu.memory_space<vmem>>, vector<1x128xf32>
    %cst_7 = arith.constant dense<0.000000e+00> : vector<8x128xf32>
    %10 = tpu.matmul %7, %8, %cst_7 {dimension_numbers = #tpu.dot_dimension_numbers<[1], [0], [0], [1], [0, 0, 1, 1], [], []>} : vector<8x128xf32>, vector<128x128xf32>, vector<8x128xf32> -> vector<8x128xf32>
    %11 = vector.broadcast %9 : vector<1x128xf32> to vector<8x128xf32>
    %12 = arith.addf %10, %11 : vector<8x128xf32>
    %cst_8 = arith.constant 0.000000e+00 : f32
    %13 = vector.broadcast %cst_8 : f32 to vector<8x128xf32>
    %14 = arith.maximumf %12, %13 : vector<8x128xf32>
    %c160 = arith.constant 160 : index
    %c0_9 = arith.constant 0 : index
    %15 = vector.load %arg2[%c160, %c0_9] : memref<296x128xf32, #tpu.memory_space<vmem>>, vector<128x128xf32>
    %c288 = arith.constant 288 : index
    %c0_10 = arith.constant 0 : index
    %16 = vector.load %arg2[%c288, %c0_10] : memref<296x128xf32, #tpu.memory_space<vmem>>, vector<1x128xf32>
    %cst_11 = arith.constant dense<0.000000e+00> : vector<8x128xf32>
    %17 = tpu.matmul %14, %15, %cst_11 {dimension_numbers = #tpu.dot_dimension_numbers<[1], [0], [0], [1], [0, 0, 1, 1], [], []>} : vector<8x128xf32>, vector<128x128xf32>, vector<8x128xf32> -> vector<8x128xf32>
    %18 = vector.broadcast %16 : vector<1x128xf32> to vector<8x128xf32>
    %19 = arith.addf %17, %18 : vector<8x128xf32>
    %20 = vector.extract_strided_slice %19 {offsets = [0, 0], sizes = [8, 8], strides = [1, 1]} : vector<8x128xf32> to vector<8x8xf32>
    %21 = math.tanh %20 : vector<8x8xf32>
    %c0_12 = arith.constant 0 : index
    %c0_13 = arith.constant 0 : index
    %22 = vector.load %arg3[%c0_12, %c0_13] : memref<8x8xf32, #tpu.memory_space<vmem>>, vector<8x8xf32>
    tpu.vector_store %arg3[%c0_12, %c0_13], %21 {strides = array<i32>} : memref<8x8xf32, #tpu.memory_space<vmem>>, vector<8x8xf32>,
    return
  }
  func.func @transform_0(%arg0: i32) -> (i32, i32) {
    %c0_i32 = arith.constant 0 : i32
    %c0_i32_0 = arith.constant 0 : i32
    return %arg0, %c0_i32 : i32, i32
  }
  func.func @transform_1(%arg0: i32) -> (i32, i32) {
    %c0_i32 = arith.constant 0 : i32
    %c0_i32_0 = arith.constant 0 : i32
    %c0_i32_1 = arith.constant 0 : i32
    return %c0_i32, %c0_i32_0 : i32, i32
  }
  func.func @transform_2(%arg0: i32) -> (i32, i32) {
    %c0_i32 = arith.constant 0 : i32
    %c0_i32_0 = arith.constant 0 : i32
    return %arg0, %c0_i32 : i32, i32
  }
}

</mosaic_0001>

<bundles_post_ra>
// kernel: actor_net_forward.1
= control target key start
LH: loop header
LB: loop body
LE: loop exit
PB: predicated region body
PF: predicated region fallthrough
CT: control target
= control target key end

     0   :  { %7 = vsyncpa [#allocation3], 0  ;;  %s660_s0 = inlined_call_operand.hbm [shape: f32[8,16], index: 0, kind: input, shape index: {}]   ;;  %s661_s1 = inlined_call_operand.hbm [shape: f32[296,128], index: 1, kind: input, shape index: {}]   ;;  %s662_s2 = inlined_call_operand.hbm [shape: f32[8,8], index: 2, kind: output, shape index: {}]  }
   0x1   :  { %8 = vsyncpa [#allocation6], 0 }
   0x2   :  { %9 = vsyncpa [#allocation4], 0  ;;  %s574_s9 = smov [#allocation2]   ;;  %s575_s11 = smov [#allocation5]  }
   0x3   :  { %s16_s10 = sshll.u32 %s574_s9, 4  ;;  %s25_s12 = sshll.u32 %s575_s11, 4  ;;  %s17_s10 = int_to_ptr.vmem [resolvable:$true] %s16_s10  ;;  %s597_s12 = int_to_ptr.vmem [resolvable:$true] %s25_s12 }
   0x4   :  { %s502_s15 = scalar_lea.hbm %s660_s0, 128 }
   0x5   :  { %p503_p0 = scmp.ne.s32.totalorder %s660_s0, %s502_s15  ;;  %p506_p1 = scmp.lt.u32.totalorder %s502_s15, %s660_s0 }
   0x7   :  { %p508_p2 = pnand %p506_p1, %p503_p0 }
   0x9   :  { %511 = shalt.err (!%p508_p2)
}
   0xa   :  { %s512_s20 = scalar_lea.vmem %s17_s10, 128  ;;  %p517_p4 = scmp.lt.s32.totalorder %s17_s10, %s17_s10 }
   0xb   :  { %p513_p3 = scmp.ne.s32.totalorder %s17_s10, %s512_s20  ;;  %p518_p5 = scmp.lt.s32.totalorder %s512_s20, %s512_s20 }
   0xd   :  { %p519_p6 = por %p518_p5, %p517_p4 }
   0xf   :  { %p520_p7 = pnand %p519_p6, %p513_p3 }
  0x11   :  { %523 = shalt.err (!%p520_p7)
}
  0x12   :  { %19 = dma.hbm_to_vmem [thread:$0]  %s660_s0, 128, %s17_s10, [#allocation3]  }
  0x13   :  { %s524_s25 = scalar_lea.hbm %s661_s1, 4736 }
  0x14   :  { %p525_p8 = scmp.ne.s32.totalorder %s661_s1, %s524_s25  ;;  %p528_p9 = scmp.lt.u32.totalorder %s524_s25, %s661_s1 }
  0x16   :  { %p530_p10 = pnand %p528_p9, %p525_p8 }
  0x18   :  { %533 = shalt.err (!%p530_p10)
}
  0x19   :  { %s534_s30 = scalar_lea.vmem %s597_s12, 4736  ;;  %p539_p12 = scmp.lt.s32.totalorder %s597_s12, %s597_s12 }
  0x1a   :  { %p535_p11 = scmp.ne.s32.totalorder %s597_s12, %s534_s30  ;;  %p540_p13 = scmp.lt.s32.totalorder %s534_s30, %s534_s30 }
  0x1c   :  { %p541_p0 = por %p540_p13, %p539_p12 }
  0x1e   :  { %p542_p1 = pnand %p541_p0, %p535_p11 }
  0x20   :  { %545 = shalt.err (!%p542_p1)
}
  0x21   :  { %s576_s0 = smov 128   ;;  %s577_s3 = smov 8  }
  0x22   :  { %31 = dma.hbm_to_vmem [thread:$0]  %s661_s1, 4736, %s597_s12, [#allocation6], %s576_s0, %s576_s0, %s577_s3  }
  0x23   :  { %568 = dma.done.wait [#allocation3], 128  }
  0x24   :  { %569 = vsyncadd [#allocation3], 4294967168 }
  0x25   :  { %570 = dma.done.wait [#allocation6], 4736  }
  0x26   :  { %571 = vsyncadd [#allocation6], 4294962560  ;;  %v578_v0 = vmov 0.0|0.0   ;;  %vm579_vm0 = vmmov 0   ;;  %v580_v1 = vmov 0.0   ;;  %v39_v2 = vld [vmem:[#allocation5] sm:$0xff] }
  0x27   :  { %441 = vmatprep.subr.bf16.mxu0 %v578_v0  ;;  %368 = vmatprep.mubr.msk.f32.mxu0 %vm579_vm0, %v580_v1  ;;  %v40_v3 = vld [vmem:[#allocation5 + $0x8] sm:$0xff]  ;;  %v121_v5 = vld [vmem:[#allocation5 + $0x18] sm:$0xff]  ;;  %v122_v6 = vld [vmem:[#allocation5 + $0x20] sm:$0xff]  ;;  %vm46_vm1 = vcmask 130048   ;;  %s581_s1 = smov [#allocation7]   ;;  %vm305_vm2 = vcmask 64512  }
  0x28   :  { %444 = vmatprep.subr.bf16.mxu1 %v578_v0  ;;  %403 = vmatprep.mubr.msk.f32.mxu1 %vm579_vm0, %v580_v1  ;;  %v442_v4 = vpack.c.bf16 %v40_v3, %v39_v2  ;;  %v123_v7 = vld [vmem:[#allocation5 + $0x28] sm:$0xff]  ;;  %v445_v8 = vpack.c.bf16 %v122_v6, %v121_v5  ;;  %v124_v9 = vld [vmem:[#allocation5 + $0x30] sm:$0xff]  ;;  %v38_v10 = vld [vmem:[#allocation2] sm:$0xff]  ;;  %s313_s6 = sshll.u32 %s581_s1, 4  ;;  %s314_s6 = int_to_ptr.vmem [resolvable:$true] %s313_s6 }
  0x29   :  { %v448_v11 = vpack.c.bf16 %v124_v9, %v123_v7  ;;  %v125_v12 = vld [vmem:[#allocation5 + $0x38] sm:$0xff]  ;;  %v126_v13 = vld [vmem:[#allocation5 + $0x40] sm:$0xff]  ;;  %v127_v15 = vld [vmem:[#allocation5 + $0x48] sm:$0xff]  ;;  %s546_s7 = scalar_lea.vmem %s314_s6, 128  ;;  %p551_p3 = scmp.lt.s32.totalorder %s314_s6, %s314_s6 }
  0x2a   :  { %443 = vmatpush3.bf16.msra.mxu0 %v442_v4  ;;  %446 = vmatpush3.bf16.msra.mxu1 %v445_v8  ;;  %v451_v14 = vpack.c.bf16 %v126_v13, %v125_v12  ;;  %v128_v16 = vld [vmem:[#allocation5 + $0x50] sm:$0xff]  ;;  %v129_v18 = vld [vmem:[#allocation5 + $0x58] sm:$0xff]  ;;  %v130_v19 = vld [vmem:[#allocation5 + $0x60] sm:$0xff]  ;;  %p547_p2 = scmp.ne.s32.totalorder %s314_s6, %s546_s7  ;;  %p552_p4 = scmp.lt.s32.totalorder %s546_s7, %s546_s7 }
  0x2b   :  { %468 = vmatprep.subr.bf16.mxu0 %v578_v0  ;;  %447 = vmatprep.subr.bf16.mxu1 %v578_v0  ;;  %v454_v17 = vpack.c.bf16 %v128_v16, %v127_v15  ;;  %v457_v20 = vpack.c.bf16 %v130_v19, %v129_v18  ;;  %v131_v21 = vld [vmem:[#allocation5 + $0x68] sm:$0xff]  ;;  %v132_v22 = vld [vmem:[#allocation5 + $0x70] sm:$0xff]  ;;  %v133_v24 = vld [vmem:[#allocation5 + $0x78] sm:$0xff] }
  0x2c   :  { %v460_v23 = vpack.c.bf16 %v132_v22, %v131_v21  ;;  %v134_v25 = vld [vmem:[#allocation5 + $0x80] sm:$0xff]  ;;  %v135_v27 = vld [vmem:[#allocation5 + $0x88] sm:$0xff]  ;;  %v136_v28 = vld [vmem:[#allocation5 + $0x90] sm:$0xff]  ;;  %p553_p5 = por %p552_p4, %p551_p3 }
  0x2d   :  { %369 = vmatmul.mubr.msk.f32.vlgmr.msra.gmra.mrb[0].mxu0 %vm46_vm1, %v38_v10  ;;  %v463_v26 = vpack.c.bf16 %v134_v25, %v133_v24  ;;  %v466_v29 = vpack.c.bf16 %v136_v28, %v135_v27  ;;  %v213_v30 = vld [vmem:[#allocation5 + $0xa0] sm:$0xff]  ;;  %v214_v31 = vld [vmem:[#allocation5 + $0xa8] sm:$0xff]  ;;  %v215_v32 = vld [vmem:[#allocation5 + $0xb0] sm:$0xff] }
  0x2e   :  { %438 = vmatprep.mubr.msk.f32.mxu0 %vm579_vm0, %v580_v1  ;;  %449 = vmatpush3.bf16.msra.mxu1 %v448_v11  ;;  %v469_v33 = vpack.c.bf16 %v214_v31, %v213_v30  ;;  %v216_v34 = vld [vmem:[#allocation5 + $0xb8] sm:$0xff]  ;;  %v217_v36 = vld [vmem:[#allocation5 + $0xc0] sm:$0xff]  ;;  %v218_v37 = vld [vmem:[#allocation5 + $0xc8] sm:$0xff]  ;;  %p554_p6 = pnand %p553_p5, %p547_p2 }
  0x2f   :  { %450 = vmatprep.subr.bf16.mxu1 %v578_v0  ;;  %v472_v35 = vpack.c.bf16 %v216_v34, %v215_v32  ;;  %v475_v38 = vpack.c.bf16 %v218_v37, %v217_v36  ;;  %v219_v39 = vld [vmem:[#allocation5 + $0xd0] sm:$0xff]  ;;  %v220_v40 = vld [vmem:[#allocation5 + $0xd8] sm:$0xff]  ;;  %v221_v42 = vld [vmem:[#allocation5 + $0xe0] sm:$0xff] }
  0x30   :  { %470 = vmatpush3.bf16.msra.mxu0 %v469_v33  ;;  %v478_v41 = vpack.c.bf16 %v220_v40, %v219_v39  ;;  %v222_v43 = vld [vmem:[#allocation5 + $0xe8] sm:$0xff]  ;;  %v223_v45 = vld [vmem:[#allocation5 + $0xf0] sm:$0xff]  ;;  %v224_v46 = vld [vmem:[#allocation5 + $0xf8] sm:$0xff] }
  0x31   :  { %471 = vmatprep.subr.bf16.mxu0 %v578_v0  ;;  %v481_v44 = vpack.c.bf16 %v222_v43, %v221_v42  ;;  %v484_v47 = vpack.c.bf16 %v224_v46, %v223_v45  ;;  %v225_v48 = vld [vmem:[#allocation5 + $0x100] sm:$0xff]  ;;  %v226_v49 = vld [vmem:[#allocation5 + $0x108] sm:$0xff]  ;;  %v323_v51 = vld [vmem:[#allocation5 + $0x10] ss:$0 sm:$0xff] }
  0x32   :  { %452 = vmatpush3.bf16.msra.mxu1 %v451_v14  ;;  %v487_v50 = vpack.c.bf16 %v226_v49, %v225_v48  ;;  %v227_v56 = vld [vmem:[#allocation5 + $0x110] sm:$0xff]  ;;  %v228_v57 = vld [vmem:[#allocation5 + $0x118] sm:$0xff]  ;;  %v326_v1 = vld [vmem:[#allocation5 + $0x120] ss:$0 sm:$0xff] }
  0x33   :  { %453 = vmatprep.subr.bf16.mxu1 %v578_v0  ;;  %v490_v58 = vpack.c.bf16 %v228_v57, %v227_v56  ;;  %v325_v59 = vld [vmem:[#allocation5 + $0x98] ss:$0 sm:$0xff] }
  0x34   :  { %473 = vmatpush3.bf16.msra.mxu0 %v472_v35 }
  0x35   :  { %474 = vmatprep.subr.bf16.mxu0 %v578_v0 }
  0x36   :  { %455 = vmatpush3.bf16.msra.mxu1 %v454_v17 }
  0x37   :  { %456 = vmatprep.subr.bf16.mxu1 %v578_v0 }
  0x38   :  { %476 = vmatpush3.bf16.msra.mxu0 %v475_v38 }
  0x39   :  { %477 = vmatprep.subr.bf16.mxu0 %v578_v0 }
  0x3a   :  { %458 = vmatpush3.bf16.msra.mxu1 %v457_v20 }
  0x3b   :  { %459 = vmatprep.subr.bf16.mxu1 %v578_v0 }
  0x3c   :  { %479 = vmatpush3.bf16.msra.mxu0 %v478_v41 }
  0x3d   :  { %480 = vmatprep.subr.bf16.mxu0 %v578_v0 }
  0x3e   :  { %461 = vmatpush3.bf16.msra.mxu1 %v460_v23 }
  0x3f   :  { %462 = vmatprep.subr.bf16.mxu1 %v578_v0 }
  0x40   :  { %482 = vmatpush3.bf16.msra.mxu0 %v481_v44 }
  0x41   :  { %483 = vmatprep.subr.bf16.mxu0 %v578_v0 }
  0x42   :  { %464 = vmatpush3.bf16.msra.mxu1 %v463_v26 }
  0x43   :  { %465 = vmatprep.subr.bf16.mxu1 %v578_v0 }
  0x44   :  { %485 = vmatpush3.bf16.msra.mxu0 %v484_v47 }
  0x45   :  { %486 = vmatprep.subr.bf16.mxu0 %v578_v0 }
  0x46   :  { %467 = vmatpush3.bf16.msra.mxu1 %v466_v29 }
  0x48   :  { %488 = vmatpush3.bf16.msra.mxu0 %v487_v50 }
  0x49   :  { %489 = vmatprep.subr.bf16.mxu0 %v578_v0 }
  0x4c   :  { %491 = vmatpush3.bf16.msra.mxu0 %v490_v58 }
 0x100   :  { %v116_v52 = vpop.f32.mrb[0].mxu0 }
 0x101   :  { %v117_v53 = vadd.f32 %v323_v51, %v116_v52  ;;  %v370_v54 = vpop.f32.mrb[1].mxu0 }
 0x103   :  { %v120_v55 = vmax.f32 %v117_v53, 0.0 }
 0x105   :  { %404 = vmatmul.mubr.f32.vlgmr.msra.gmra.mrb[0].mxu1 %v120_v55 }
 0x1d8   :  { %v208_v60 = vpop.f32.mrb[0].mxu1 }
 0x1d9   :  { %v209_v61 = vadd.f32 %v325_v59, %v208_v60  ;;  %v405_v62 = vpop.f32.mrb[1].mxu1 }
 0x1db   :  { %v212_v63 = vmax.f32 %v209_v61, 0.0 }
 0x1dd   :  { %439 = vmatmul.mubr.f32.vlgmr.msra.gmra.mrb[2].mxu0 %v212_v63 }
 0x2b0   :  { %v300_v2 = vpop.f32.mrb[2].mxu0 }
 0x2b1   :  { %v301_v3 = vadd.f32 %v326_v1, %v300_v2  ;;  %v440_v0 = vpop.f32.mrb[3].mxu0 }
 0x2b3   :  { %500 = vtanh.f32 %v301_v3 }
 0x2bd   :  { %v501_v4 = vpop.eup %500 }
 0x2be   :  { %306 = vst.msk [vmem:[#allocation7] sm:$0xff] %vm305_vm2, %v501_v4 }
 0x2bf   :  { %557 = shalt.err (!%p554_p6)
}
 0x2c0   :  { %s558_s10 = scalar_lea.hbm %s662_s2, 128 }
 0x2c1   :  { %p559_p7 = scmp.ne.s32.totalorder %s662_s2, %s558_s10  ;;  %p562_p8 = scmp.lt.u32.totalorder %s558_s10, %s662_s2 }
 0x2c3   :  { %p564_p9 = pnand %p562_p8, %p559_p7 }
 0x2c5   :  { %567 = shalt.err (!%p564_p9)
}
 0x2c6   :  { %316 = dma.vmem_to_hbm [thread:$0]  %s314_s6, 128, %s662_s2, [#allocation4]  }
 0x2c7   :  { %572 = dma.done.wait [#allocation4], 128  }
 0x2c8   :  { %573 = vsyncadd [#allocation4], 4294967168 }
 0x2c9   :  { %320 = vsyncpa [#allocation3], 1 }
 0x2ca   :  { %321 = vsyncpa [#allocation6], 1 }
 0x2cb   :  { %322 = vsyncpa [#allocation4], 1 }

</bundles_post_ra>
